<compile_context>
chip_gen: v7x
topology: tpu7x:2x2x1
jax: 0.10.0
libtpu: 0.0.40
codegen_flags: <defaults>
</compile_context>

<pallas_src>
import functools
import math

import numpy as np
import jax
import jax.numpy as jnp
from jax.experimental import pallas as pl
from jax.experimental.pallas import tpu as pltpu


def _gaussian_rbf_kernel(x_ref, sel_ref, centers_ref, o_ref, *, neg_weight, groups):
    """Compute one (TILE_R, L) lane-dense output tile.

    x_ref:       (TILE_R, G)  packed query positions (G batch rows per output row)
    sel_ref:     (G, L)       0/1 selector expanding column g across its num-lane group
    centers_ref: (1, L)       RBF centers tiled G times along the lane axis
    o_ref:       (TILE_R, L)  output tile (L = G * num)
    """
    centers = centers_ref[...]                                  # (1, L)
    if groups == 1:
        # Plain lane-broadcast path (num already a multiple of 128, or fallback).
        diff = centers - x_ref[...]                             # (TILE_R, L)
    else:
        # x_wide[r, c] = x[r, c // num] via a tiny MXU matmul (no reshapes).
        # HIGHEST precision keeps x at ~f32 accuracy (default would truncate
        # the operand to bf16 before the MXU).
        x_wide = jnp.dot(x_ref[...], sel_ref[...],
                         preferred_element_type=jnp.float32,
                         precision=jax.lax.Precision.HIGHEST)   # (TILE_R, L)
        diff = centers - x_wide
    # (centers - x)^2 == (x - centers)^2, so the sign of diff is irrelevant.
    o_ref[...] = jnp.exp(neg_weight * diff * diff)


def gaussian_rbf(x, low, high, num, *, tile_rows=2048, min_grid_steps=4):
    """Pallas TPU forward of GaussianRBF.

    x: (B,) or (B, 1) float32 query positions.  Returns (B, num) float32.
    """
    low, high, num = float(low), float(high), int(num)
    x_flat = jnp.asarray(x, jnp.float32).reshape(-1)
    B = int(x_flat.shape[0])

    # --- static parameters (mirror GaussianRBF.__init__) --------------------
    centers = (np.arange(num, dtype=np.float32) / np.float32(num)) * (high - low) + low
    neg_weight = -(num / (high - low))            # negation folded into the weight

    # --- lane packing: G batch rows per lcm(num,128)-lane output row ---------
    groups = 128 // math.gcd(num, 128)            # lanes = lcm(num, 128)
    lanes = groups * num
    # Keep the resident selector and a minimal (8-row) output tile small; for
    # pathological num (e.g. large odd values) fall back to masked stores.
    if groups > 1 and (groups * lanes * 4 > (1 << 20) or 8 * lanes * 4 > (1 << 20)):
        groups, lanes = 1, num

    sel = jnp.asarray(np.repeat(np.eye(groups, dtype=np.float32), num, axis=1))  # (G, L)
    centers_row = jnp.asarray(np.tile(centers, groups)[None, :])                 # (1, L)

    # --- pack the batch; pad only up to groups-1 elements --------------------
    pad_b = (-B) % groups
    if pad_b:
        x_flat = jnp.pad(x_flat, (0, pad_b))
    rows = (B + pad_b) // groups
    x_packed = x_flat.reshape(rows, groups)

    # --- tiling over the packed-row dimension --------------------------------
    # Cap one output tile at ~4 MiB so the double-buffered footprint stays well
    # inside every generation's scoped VMEM default (v5e 16 MiB).
    vmem_budget_rows = max(8, ((4 << 20) // (lanes * 4)) // 8 * 8)
    tile_r = min(int(tile_rows), vmem_budget_rows)
    # Keep >= min_grid_steps grid steps when the batch allows, so v7x's two
    # TensorCores both get work ("parallel" shards the grid axis). Costs
    # nothing on v5e/v6e for large batches (tile stays at tile_rows there).
    tile_r = min(tile_r, max(8, pl.cdiv(pl.cdiv(rows, int(min_grid_steps)), 8) * 8))
    grid = (pl.cdiv(rows, tile_r),)               # non-divisible grid: last block masked

    kernel = functools.partial(_gaussian_rbf_kernel,
                               neg_weight=neg_weight, groups=groups)

    cost = pl.CostEstimate(
        flops=int(rows * lanes * (3 + 2 * groups)),
        transcendentals=int(rows * lanes),
        bytes_accessed=int(4 * (rows * lanes            # output (dominant)
                                + rows * groups         # packed x
                                + lanes * (groups + 1))),  # selector + centers
    )

    out = pl.pallas_call(
        kernel,
        out_shape=jax.ShapeDtypeStruct((rows, lanes), jnp.float32),
        grid=grid,
        in_specs=[
            pl.BlockSpec((tile_r, groups), lambda i: (i, 0)),   # x: streamed per tile
            pl.BlockSpec((groups, lanes), lambda i: (0, 0)),    # selector: resident
            pl.BlockSpec((1, lanes), lambda i: (0, 0)),         # centers: resident
        ],
        out_specs=pl.BlockSpec((tile_r, lanes), lambda i: (i, 0)),
        compiler_params=pltpu.CompilerParams(
            dimension_semantics=("parallel",),      # megacore-shard the batch axis
        ),
        cost_estimate=cost,
    )(x_packed, sel, centers_row)

    # (rows, G*num) row-major is exactly (rows*G, num); zero-copy when aligned.
    out2d = out.reshape(rows * groups, num)
    return out2d if pad_b == 0 else out2d[:B]


def gaussian_rbf_ref(x, low, high, num):
    centers = (jnp.arange(num, dtype=jnp.float32) / num) * (high - low) + low
    weight = num / (high - low)
    return jnp.exp(-weight * (centers[None, :] - jnp.asarray(x, jnp.float32).reshape(-1, 1)) ** 2)


if __name__ == "__main__":
    low, high, num = 0.0, 8.0, 32
    key = jax.random.PRNGKey(0)

    # Small shape consistent with the module's (B, 1) -> (B, num) broadcast.
    B = 8
    x = jax.random.uniform(key, (B, 1), dtype=jnp.float32) * (high - low) + low
    out = jax.block_until_ready(gaussian_rbf(x, low, high, num))
    ref = gaussian_rbf_ref(x, low, high, num)
    assert out.shape == (B, num)
    assert jnp.allclose(out, ref, atol=1e-5, rtol=1e-5)

    # Ragged batch (exercises B % groups != 0 padding + partial last block).
    B2 = 13
    x2 = jax.random.uniform(jax.random.PRNGKey(1), (B2, 1), dtype=jnp.float32) * (high - low) + low
    out2 = jax.block_until_ready(gaussian_rbf(x2, low, high, num))
    ref2 = gaussian_rbf_ref(x2, low, high, num)
    assert out2.shape == (B2, num)
    assert jnp.allclose(out2, ref2, atol=1e-5, rtol=1e-5)

    print("KERNEL_OK")
</pallas_src>

<mosaic_0001>
module attributes {stable_mosaic.version = 11 : i64} {
  func.func @_gaussian_rbf_kernel(%arg0: i32, %arg1: memref<8x4xf32, #tpu.memory_space<vmem>>, %arg2: memref<4x128xf32, #tpu.memory_space<vmem>>, %arg3: memref<1x128xf32, #tpu.memory_space<vmem>>, %arg4: memref<8x128xf32, #tpu.memory_space<vmem>>) attributes {dimension_semantics = [#tpu.dimension_semantics<parallel>], iteration_bounds = array<i64: 1>, scalar_prefetch = 0 : i64, scratch_operands = 0 : i64, tpu.core_type = #tpu.core_type<tc>, window_params = [{transform_indices = @transform_0, window_bounds = array<i64: 8, 4>}, {pipeline_mode = #tpu.pipeline_mode<synchronous>, transform_indices = @transform_1, window_bounds = array<i64: 4, 128>}, {pipeline_mode = #tpu.pipeline_mode<synchronous>, transform_indices = @transform_2, window_bounds = array<i64: 1, 128>}, {transform_indices = @transform_3, window_bounds = array<i64: 8, 128>}]} {
    %c0 = arith.constant 0 : index
    %c0_0 = arith.constant 0 : index
    %0 = vector.load %arg3[%c0, %c0_0] : memref<1x128xf32, #tpu.memory_space<vmem>>, vector<1x128xf32>
    %c0_1 = arith.constant 0 : index
    %c0_2 = arith.constant 0 : index
    %1 = vector.load %arg1[%c0_1, %c0_2] : memref<8x4xf32, #tpu.memory_space<vmem>>, vector<8x4xf32>
    %c0_3 = arith.constant 0 : index
    %c0_4 = arith.constant 0 : index
    %2 = vector.load %arg2[%c0_3, %c0_4] : memref<4x128xf32, #tpu.memory_space<vmem>>, vector<4x128xf32>
    %cst = arith.constant dense<0.000000e+00> : vector<8x128xf32>
    %3 = tpu.matmul %1, %2, %cst {dimension_numbers = #tpu.dot_dimension_numbers<[1], [0], [0], [1], [0, 0, 1, 1], [], []>, precision = #tpu.contract_precision<fp32>} : vector<8x4xf32>, vector<4x128xf32>, vector<8x128xf32> -> vector<8x128xf32>
    %4 = vector.broadcast %0 : vector<1x128xf32> to vector<8x128xf32>
    %5 = arith.subf %4, %3 : vector<8x128xf32>
    %cst_5 = arith.constant -4.000000e+00 : f32
    %6 = vector.broadcast %cst_5 : f32 to vector<8x128xf32>
    %7 = arith.mulf %6, %5 : vector<8x128xf32>
    %8 = arith.mulf %7, %5 : vector<8x128xf32>
    %9 = math.exp %8 : vector<8x128xf32>
    %c0_6 = arith.constant 0 : index
    %c0_7 = arith.constant 0 : index
    %10 = vector.load %arg4[%c0_6, %c0_7] : memref<8x128xf32, #tpu.memory_space<vmem>>, vector<8x128xf32>
    tpu.vector_store %arg4[%c0_6, %c0_7], %9 {strides = array<i32>} : memref<8x128xf32, #tpu.memory_space<vmem>>, vector<8x128xf32>,
    return
  }
  func.func @transform_0(%arg0: i32) -> (i32, i32) {
    %c0_i32 = arith.constant 0 : i32
    %c0_i32_0 = arith.constant 0 : i32
    return %arg0, %c0_i32 : i32, i32
  }
  func.func @transform_1(%arg0: i32) -> (i32, i32) {
    %c0_i32 = arith.constant 0 : i32
    %c0_i32_0 = arith.constant 0 : i32
    %c0_i32_1 = arith.constant 0 : i32
    return %c0_i32, %c0_i32_0 : i32, i32
  }
  func.func @transform_2(%arg0: i32) -> (i32, i32) {
    %c0_i32 = arith.constant 0 : i32
    %c0_i32_0 = arith.constant 0 : i32
    %c0_i32_1 = arith.constant 0 : i32
    return %c0_i32, %c0_i32_0 : i32, i32
  }
  func.func @transform_3(%arg0: i32) -> (i32, i32) {
    %c0_i32 = arith.constant 0 : i32
    %c0_i32_0 = arith.constant 0 : i32
    return %arg0, %c0_i32 : i32, i32
  }
}

</mosaic_0001>

<bundles_post_ra>
// kernel: tpu_custom_call.1
= control target key start
LH: loop header
LB: loop body
LE: loop exit
PB: predicated region body
PF: predicated region fallthrough
CT: control target
= control target key end

     0   :  { %8 = vsyncpa [#allocation3], 0  ;;  %s739_s0 = inlined_call_operand.hbm [shape: f32[2,4], index: 0, kind: input, shape index: {}]   ;;  %s740_s1 = inlined_call_operand.hbm [shape: f32[4,128], index: 1, kind: input, shape index: {}]   ;;  %s741_s2 = inlined_call_operand.vmem [shape: f32[1,128], index: 2, kind: input, shape index: {}]   ;;  %s742_s3 = inlined_call_operand.hbm [shape: f32[2,128], index: 3, kind: output, shape index: {}]  }
   0x1   :  { %9 = vsyncpa [#allocation6], 0 }
   0x2   :  { %10 = vsyncpa [#allocation4], 0 }
   0x3   :  { %15 = vsyncadd [#allocation3], 96  ;;  %s661_s12 = smov [#allocation2]   ;;  %s589_s16 = scalar_lea.hbm %s739_s0, 32 }
   0x4   :  { %s16_s13 = sshll.u32 %s661_s12, 4  ;;  %p590_p0 = scmp.ne.s32.totalorder %s739_s0, %s589_s16  ;;  %s17_s13 = int_to_ptr.vmem [resolvable:$true] %s16_s13 }
   0x5   :  { %p593_p1 = scmp.lt.u32.totalorder %s589_s16, %s739_s0 }
   0x7   :  { %p595_p2 = pnand %p593_p1, %p590_p0 }
   0x9   :  { %598 = shalt.err (!%p595_p2)
}
   0xa   :  { %s599_s21 = scalar_lea.vmem %s17_s13, 32  ;;  %s603_s22 = scalar_lea.vmem %s17_s13, 128 }
   0xb   :  { %p600_p3 = scmp.ne.s32.totalorder %s17_s13, %s599_s21  ;;  %p604_p4 = scmp.lt.s32.totalorder %s17_s13, %s17_s13 }
   0xc   :  { %p605_p5 = scmp.lt.s32.totalorder %s603_s22, %s599_s21 }
   0xe   :  { %p606_p6 = por %p605_p5, %p604_p4 }
  0x10   :  { %p607_p7 = pnand %p606_p6, %p600_p3 }
  0x12   :  { %610 = shalt.err (!%p607_p7)
}
  0x13   :  { %s662_s23 = smov 32   ;;  %s663_s24 = smov 2  }
  0x14   :  { %22 = dma.hbm_to_vmem [thread:$0]  %s739_s0, 32, %s17_s13, [#allocation3], %s662_s23, %s662_s23, %s663_s24  }
  0x15   :  { %s664_s27 = smov [#allocation5]   ;;  %s611_s4 = scalar_lea.hbm %s740_s1, 64 }
  0x16   :  { %s29_s28 = sshll.u32 %s664_s27, 4  ;;  %p612_p8 = scmp.ne.s32.totalorder %s740_s1, %s611_s4  ;;  %s30_s28 = int_to_ptr.vmem [resolvable:$true] %s29_s28 }
  0x17   :  { %p615_p9 = scmp.lt.u32.totalorder %s611_s4, %s740_s1 }
  0x19   :  { %p617_p10 = pnand %p615_p9, %p612_p8 }
  0x1b   :  { %620 = shalt.err (!%p617_p10)
}
  0x1c   :  { %s621_s9 = scalar_lea.vmem %s30_s28, 64  ;;  %p626_p12 = scmp.lt.s32.totalorder %s30_s28, %s30_s28 }
  0x1d   :  { %p622_p11 = scmp.ne.s32.totalorder %s30_s28, %s621_s9  ;;  %p627_p13 = scmp.lt.s32.totalorder %s621_s9, %s621_s9 }
  0x1f   :  { %p628_p0 = por %p627_p13, %p626_p12 }
  0x21   :  { %p629_p1 = pnand %p628_p0, %p622_p11 }
  0x23   :  { %632 = shalt.err (!%p629_p1)
}
  0x24   :  { %32 = dma.hbm_to_vmem [thread:$0]  %s740_s1, 64, %s30_s28, [#allocation6]  }
  0x25   :  { %655 = dma.done.wait [#allocation3], 128  }
  0x26   :  { %656 = vsyncadd [#allocation3], 4294967168 }
  0x27   :  { %657 = dma.done.wait [#allocation6], 64  }
  0x28   :  { %658 = vsyncadd [#allocation6], 4294967232  ;;  %v665_v0 = vmov 0.0   ;;  %vm666_vm0 = vmmov 0   ;;  %vm48_vm1 = vcmask 1043456   ;;  %vm44_vm2 = vcmask 31744  }
  0x29   :  { %556 = vmatprep.subr.mxu0 %v665_v0  ;;  %558 = vmatprep.mubr.msk.f32.mxu0 %vm666_vm0, %v665_v0  ;;  %v43_v1 = vld [vmem:[#allocation5] sm:$0xf]  ;;  %v42_v2 = vld [vmem:[#allocation2] sm:$0xff] }
  0x2a   :  { %541 = vmatprep.subr.mxu1 %v665_v0  ;;  %543 = vmatprep.mubr.msk.f32.mxu1 %vm666_vm0, %v665_v0  ;;  %v50_v3 = vsel %vm48_vm1, %v43_v1, 0  ;;  %v46_v4 = vsel %vm44_vm2, %v42_v2, 0  ;;  %v528_v17 = vld [vmem:[%s741_s2] ss:$0 sm:$0xff] }
  0x2b   :  { %v53_v5 = vand.u32 4294901760, %v50_v3  ;;  %v118_v6 = vand.u32 4294901760, %v46_v4 }
  0x2d   :  { %v130_v7 = vsub.f32 %v50_v3, %v53_v5  ;;  %557 = vmatpush3.msra.mxu0 %v53_v5  ;;  %v119_v8 = vsub.f32 %v46_v4, %v118_v6  ;;  %542 = vmatpush3.msra.mxu1 %v53_v5 }
  0x2e   :  { %546 = vmatprep.subr.mxu1 %v665_v0  ;;  %561 = vmatprep.subr.mxu0 %v665_v0 }
  0x2f   :  { %v120_v9 = vand.u32 4294901760, %v119_v8  ;;  %v131_v10 = vand.u32 4294901760, %v130_v7 }
  0x31   :  { %559 = vmatmul.mubr.f32.vlgmr.msra.gmra.mrb[0].mxu0 %v120_v9  ;;  %v121_v11 = vsub.f32 %v119_v8, %v120_v9  ;;  %v132_v12 = vsub.f32 %v130_v7, %v131_v10 }
  0x32   :  { %562 = vmatpush3.msra.mxu0 %v131_v10  ;;  %563 = vmatprep.mubr.msk.f32.mxu0 %vm666_vm0, %v665_v0 }
  0x33   :  { %v122_v13 = vand.u32 4294901760, %v121_v11  ;;  %v133_v14 = vand.u32 4294901760, %v132_v12  ;;  %566 = vmatprep.subr.mxu0 %v665_v0 }
  0x35   :  { %544 = vmatmul.mubr.f32.vlgmr.msra.gmra.mrb[0].mxu1 %v122_v13 }
  0x36   :  { %547 = vmatpush3.msra.mxu1 %v133_v14  ;;  %548 = vmatprep.mubr.msk.f32.mxu1 %vm666_vm0, %v665_v0 }
  0x37   :  { %551 = vmatprep.subr.mxu1 %v665_v0 }
  0x39   :  { %564 = vmatmul.mubr.f32.vlgmr.msra.gmra.mrb[0].mxu0 %v118_v6 }
  0x3a   :  { %567 = vmatpush3.msra.mxu0 %v53_v5  ;;  %568 = vmatprep.mubr.msk.f32.mxu0 %vm666_vm0, %v665_v0 }
  0x3d   :  { %549 = vmatmul.mubr.f32.vlgmr.msra.gmra.mrb[0].mxu1 %v118_v6 }
  0x3e   :  { %552 = vmatpush3.msra.mxu1 %v130_v7  ;;  %553 = vmatprep.mubr.msk.f32.mxu1 %vm666_vm0, %v665_v0 }
  0x41   :  { %569 = vmatmul.mubr.f32.vlgmr.msra.gmra.mrb[0].mxu0 %v118_v6 }
  0x45   :  { %554 = vmatmul.mubr.f32.vlgmr.msra.gmra.mrb[0].mxu1 %v119_v8 }
 0x114   :  { %v494_v15 = vpop.f32.mrb[0].mxu0 }
 0x115   :  { %v570_v16 = vpop.f32.mrb[1].mxu0 }
 0x118   :  { %v274_v18 = vpop.f32.mrb[0].mxu1 }
 0x119   :  { %v571_v19 = vadd.f32 %v494_v15, %v274_v18  ;;  %v555_v20 = vpop.f32.mrb[1].mxu1 }
 0x11b   :  { %v504_v21 = vsub.f32 %v528_v17, %v571_v19 }
 0x11d   :  { %v505_v22 = vmul.f32 -4.0, %v504_v21 }
 0x11f   :  { %v506_v23 = vmul.f32 %v505_v22, %v504_v21 }
 0x121   :  { %v507_v24 = vmul.f32 1.442695, %v506_v23 }
 0x123   :  { %587 = vpow2.f32 %v507_v24 }
 0x12d   :  { %v588_v25 = vpop.eup %587 }
 0x12e   :  { %509 = vst [vmem:[#allocation7] sm:$0xff] %v588_v25 }
 0x12f   :  { %514 = vsyncadd [#allocation4], 96  ;;  %s667_s12 = smov [#allocation7]  }
 0x130   :  { %s515_s13 = sshll.u32 %s667_s12, 4  ;;  %s516_s13 = int_to_ptr.vmem [resolvable:$true] %s515_s13 }
 0x131   :  { %s633_s14 = scalar_lea.vmem %s516_s13, 32  ;;  %s637_s15 = scalar_lea.vmem %s516_s13, 128 }
 0x132   :  { %p634_p2 = scmp.ne.s32.totalorder %s516_s13, %s633_s14  ;;  %p638_p3 = scmp.lt.s32.totalorder %s516_s13, %s516_s13 }
 0x133   :  { %p639_p4 = scmp.lt.s32.totalorder %s637_s15, %s633_s14 }
 0x135   :  { %p640_p5 = por %p639_p4, %p638_p3 }
 0x137   :  { %p641_p6 = pnand %p640_p5, %p634_p2 }
 0x139   :  { %644 = shalt.err (!%p641_p6)
}
 0x13a   :  { %s645_s17 = scalar_lea.hbm %s742_s3, 32 }
 0x13b   :  { %p646_p7 = scmp.ne.s32.totalorder %s742_s3, %s645_s17  ;;  %p649_p8 = scmp.lt.u32.totalorder %s645_s17, %s742_s3 }
 0x13d   :  { %p651_p9 = pnand %p649_p8, %p646_p7 }
 0x13f   :  { %654 = shalt.err (!%p651_p9)
}
 0x140   :  { %521 = dma.vmem_to_hbm [thread:$0]  %s516_s13, 32, %s742_s3, [#allocation4], %s662_s23, %s662_s23, %s663_s24  }
 0x141   :  { %659 = dma.done.wait [#allocation4], 128  }
 0x142   :  { %660 = vsyncadd [#allocation4], 4294967168 }
 0x143   :  { %525 = vsyncpa [#allocation3], 1 }
 0x144   :  { %526 = vsyncpa [#allocation6], 1 }
 0x145   :  { %527 = vsyncpa [#allocation4], 1 }

</bundles_post_ra>
